<compile_context>
chip_gen: v7x
topology: tpu7x:2x2x1
jax: 0.10.0
libtpu: 0.0.40
codegen_flags: <defaults>
</compile_context>

<pallas_src>
import functools

import jax
import jax.numpy as jnp
from jax.experimental import pallas as pl
from jax.experimental.pallas import tpu as pltpu

# ----- model hyper-parameters (small, deterministic) -----
INPUT_CHANNELS = 4
HIDDEN_CHANNELS = 32
HIDDEN_HIDDEN_CHANNELS = 32
NUM_HIDDEN_LAYERS = 3          # -> 2 "inner" linears in the ModuleList

BATCH = 2
SEQ = 9                        # intentionally not a multiple of 8: exercises padding


def _round_up(x, m):
    return ((x + m - 1) // m) * m


def _choose_tile(n_rows, *, tm_target=2048, min_tiles=2, sublane=8):
    """Pick (tm, n_pad) for the row dimension.

    - Large N: ~tm_target rows/tile, balanced across cdiv(N, tm_target) tiles.
    - Always >= `min_tiles` tiles once there is enough work to split, so the
      "parallel" grid axis keeps both v7x TensorCores busy (harmless extra
      ~0.35us/step on 1-TC chips).
    - tm is padded only to the 8-row sublane granule, so total pad waste is
      < 8 rows per tile instead of up to tm-1 rows.
    """
    n8 = _round_up(max(n_rows, sublane), sublane)
    n_tiles = max(pl.cdiv(n8, tm_target), 1)
    if n8 >= min_tiles * sublane:
        n_tiles = max(n_tiles, min_tiles)
    tm = _round_up(pl.cdiv(n8, n_tiles), sublane)
    n_pad = _round_up(n8, tm)
    return tm, n_pad


def final_tanh_f_kernel(z_ref, w_in_ref, b_in_ref, w_hid_ref, b_hid_ref,
                        w_out_ref, b_out_ref, o_ref, *, num_hidden_layers):
    """One row-tile of the MLP: linear_in -> relu -> [linear -> relu]* -> linear_out -> tanh.

    Matmul inputs are bf16 (whatever dtype the wrapper passed); accumulation,
    bias add, relu and tanh are f32; the final store downcasts to o_ref.dtype.
    """
    compute_dtype = w_in_ref.dtype

    x = z_ref[...]                       # (tm, H)   compute_dtype
    b_in = b_in_ref[...]                 # (1, HH)   f32
    b_hid = b_hid_ref[...]               # (L-1, HH) f32  (loaded once, hoisted)
    b_out = b_out_ref[...]               # (1, OUT)  f32

    # linear_in + relu
    h = jnp.dot(x, w_in_ref[...], preferred_element_type=jnp.float32) + b_in
    h = jnp.maximum(h, 0.0)

    # hidden linears + relu (static unrolled loop; weights stacked on axis 0)
    for l in range(num_hidden_layers - 1):
        h = (jnp.dot(h.astype(compute_dtype), w_hid_ref[l],
                     preferred_element_type=jnp.float32)
             + b_hid[l:l + 1, :])
        h = jnp.maximum(h, 0.0)

    # linear_out + tanh (store bf16: halves the dominant HBM write stream)
    out = (jnp.dot(h.astype(compute_dtype), w_out_ref[...],
                   preferred_element_type=jnp.float32) + b_out)
    o_ref[...] = jnp.tanh(out).astype(o_ref.dtype)


def _mlp_jax(z_flat, params, *, compute_dtype):
    """Fused-XLA path used as the small-N fallback (same dtype policy)."""
    w_in, b_in, w_hid, b_hid, w_out, b_out = params

    def lin(x, w, b):
        return jnp.dot(x.astype(compute_dtype), w.astype(compute_dtype),
                       preferred_element_type=jnp.float32) + b

    h = jnp.maximum(lin(z_flat, w_in, b_in[0]), 0.0)
    for l in range(w_hid.shape[0]):
        h = jnp.maximum(lin(h, w_hid[l], b_hid[l]), 0.0)
    return jnp.tanh(lin(h, w_out, b_out[0]))


def final_tanh_f_forward(z, params, *, input_channels, hidden_channels,
                         num_hidden_layers, tm=None,
                         compute_dtype=jnp.bfloat16,
                         out_dtype=jnp.bfloat16,
                         min_rows_for_kernel=1024,
                         force_kernel=False,
                         reshape_output=True):
    """z: (..., hidden_channels) -> (..., hidden_channels, input_channels).

    Set reshape_output=False to keep the lane-dense flat (..., hidden*input)
    result and fold the (minor-dim=4) reshape into the consumer instead.
    """
    w_in, b_in, w_hid, b_hid, w_out, b_out = params

    lead_shape = z.shape[:-1]
    H = z.shape[-1]
    assert H == hidden_channels
    HH = w_in.shape[1]
    OUT = w_out.shape[1]
    L1 = num_hidden_layers - 1

    z_flat = z.reshape(-1, H)
    N = z_flat.shape[0]

    if N < min_rows_for_kernel and not force_kernel:
        # Below ~1K rows the fused XLA graph beats any Pallas kernel
        # (launch + per-step pipeline overhead dominate).
        out_flat = _mlp_jax(z_flat, params,
                            compute_dtype=compute_dtype).astype(out_dtype)
    else:
        if tm is None:
            tm, n_pad = _choose_tile(N)
        else:
            tm = _round_up(max(tm, 8), 8)
            n_pad = _round_up(max(N, tm), tm)

        z_flat_p = z_flat
        if n_pad != N:
            z_flat_p = jnp.pad(z_flat, ((0, n_pad - N), (0, 0)))

        # Cast activations + weights at the boundary; biases stay f32 (added
        # after the f32 accumulate inside the kernel).
        z_in = z_flat_p.astype(compute_dtype)
        w_in_c = w_in.astype(compute_dtype)
        w_hid_c = w_hid.astype(compute_dtype)
        w_out_c = w_out.astype(compute_dtype)

        kernel = functools.partial(final_tanh_f_kernel,
                                   num_hidden_layers=num_hidden_layers)

        # Advisory cost hint for XLA scheduling around the custom call.
        weight_elems = H * HH + L1 * HH * HH + HH * OUT
        cost = pl.CostEstimate(
            flops=2 * n_pad * weight_elems,
            transcendentals=n_pad * OUT,
            bytes_accessed=(n_pad * H * jnp.dtype(compute_dtype).itemsize
                            + n_pad * OUT * jnp.dtype(out_dtype).itemsize
                            + weight_elems * jnp.dtype(compute_dtype).itemsize
                            + (HH + L1 * HH + OUT) * 4))

        out_flat = pl.pallas_call(
            kernel,
            out_shape=jax.ShapeDtypeStruct((n_pad, OUT), out_dtype),
            grid_spec=pltpu.PrefetchScalarGridSpec(
                num_scalar_prefetch=0,
                grid=(n_pad // tm,),
                in_specs=[
                    pl.BlockSpec((tm, H), lambda i: (i, 0)),          # z rows
                    pl.BlockSpec((H, HH), lambda i: (0, 0)),          # W_in
                    pl.BlockSpec((1, HH), lambda i: (0, 0)),          # b_in
                    pl.BlockSpec((L1, HH, HH), lambda i: (0, 0, 0)),  # stacked hidden W
                    pl.BlockSpec((L1, HH), lambda i: (0, 0)),         # stacked hidden b
                    pl.BlockSpec((HH, OUT), lambda i: (0, 0)),        # W_out
                    pl.BlockSpec((1, OUT), lambda i: (0, 0)),         # b_out
                ],
                out_specs=pl.BlockSpec((tm, OUT), lambda i: (i, 0)),
            ),
            compiler_params=pltpu.CompilerParams(
                dimension_semantics=("parallel",)),
            cost_estimate=cost,
        )(z_in, w_in_c, b_in, w_hid_c, b_hid, w_out_c, b_out)

        if n_pad != N:
            out_flat = out_flat[:N]

    if reshape_output:
        # glue: split last dim (hidden*input) -> (hidden_channels, input_channels).
        # NOTE: this makes the minor dim = input_channels (4) which TPU layouts
        # pad to 128 lanes; keep the flat result (reshape_output=False) when the
        # consumer can fold the view itself.
        return out_flat.reshape(*lead_shape, hidden_channels, input_channels)
    return out_flat.reshape(*lead_shape, OUT)


def init_params(key, input_channels, hidden_channels, hidden_hidden_channels,
                num_hidden_layers, dtype=jnp.float32):
    """Deterministic synthetic weights, shapes matching the PyTorch module."""
    ks = jax.random.split(key, 6)
    HH = hidden_hidden_channels
    out_dim = input_channels * hidden_channels
    scale = 0.1
    w_in = scale * jax.random.normal(ks[0], (hidden_channels, HH), dtype)
    b_in = scale * jax.random.normal(ks[1], (1, HH), dtype)
    w_hid = scale * jax.random.normal(ks[2], (num_hidden_layers - 1, HH, HH), dtype)
    b_hid = scale * jax.random.normal(ks[3], (num_hidden_layers - 1, HH), dtype)
    w_out = scale * jax.random.normal(ks[4], (HH, out_dim), dtype)
    b_out = scale * jax.random.normal(ks[5], (1, out_dim), dtype)
    return (w_in, b_in, w_hid, b_hid, w_out, b_out)


def reference_forward(z, params, *, input_channels, hidden_channels,
                      num_hidden_layers, compute_dtype=jnp.bfloat16):
    """Pure-JAX reference mirroring the PyTorch forward (f32 output, same
    bf16-matmul / f32-accumulate dtype handling as the kernel)."""
    z_flat = z.reshape(-1, z.shape[-1])
    out = _mlp_jax(z_flat, params, compute_dtype=compute_dtype)
    return out.reshape(*z.shape[:-1], hidden_channels, input_channels)


if __name__ == "__main__":
    key = jax.random.PRNGKey(0)
    k_z1, k_z2, k_p = jax.random.split(key, 3)

    params = init_params(k_p, INPUT_CHANNELS, HIDDEN_CHANNELS,
                         HIDDEN_HIDDEN_CHANNELS, NUM_HIDDEN_LAYERS)

    kwargs = dict(input_channels=INPUT_CHANNELS,
                  hidden_channels=HIDDEN_CHANNELS,
                  num_hidden_layers=NUM_HIDDEN_LAYERS)

    # --- Case 1: tiny N = 18 rows (seq=9 not a multiple of 8) --------------
    # Forces the kernel path (the default policy would use the XLA fallback
    # here) so padding + the 2-tile minimum are exercised.
    z_small = jax.random.normal(k_z1, (BATCH, SEQ, HIDDEN_CHANNELS), jnp.float32)
    out_small = final_tanh_f_forward(z_small, params, force_kernel=True, **kwargs)
    out_small = jax.block_until_ready(out_small)
    ref_small = reference_forward(z_small, params, **kwargs)
    assert out_small.shape == (BATCH, SEQ, HIDDEN_CHANNELS, INPUT_CHANNELS), out_small.shape
    assert jnp.allclose(out_small.astype(jnp.float32), ref_small,
                        atol=1e-2, rtol=1e-2), "small-N mismatch vs reference"

    # --- Case 2: medium N = 1280 rows --------------------------------------
    # Goes through the default tile policy (>= min_rows_for_kernel): 2 balanced
    # tiles of 640 rows, zero pad waste, bf16 output.
    z_med = jax.random.normal(k_z2, (4, 320, HIDDEN_CHANNELS), jnp.float32)
    out_med = final_tanh_f_forward(z_med, params, **kwargs)
    out_med = jax.block_until_ready(out_med)
    ref_med = reference_forward(z_med, params, **kwargs)
    assert out_med.shape == (4, 320, HIDDEN_CHANNELS, INPUT_CHANNELS), out_med.shape
    assert jnp.allclose(out_med.astype(jnp.float32), ref_med,
                        atol=1e-2, rtol=1e-2), "medium-N mismatch vs reference"

    print("KERNEL_OK")
</pallas_src>

<mosaic_0001>
module attributes {stable_mosaic.version = 11 : i64} {
  func.func @final_tanh_f_kernel(%arg0: i32, %arg1: memref<16x32xbf16, #tpu.memory_space<vmem>>, %arg2: memref<32x32xbf16, #tpu.memory_space<vmem>>, %arg3: memref<1x32xf32, #tpu.memory_space<vmem>>, %arg4: memref<2x32x32xbf16, #tpu.memory_space<vmem>>, %arg5: memref<2x32xf32, #tpu.memory_space<vmem>>, %arg6: memref<32x128xbf16, #tpu.memory_space<vmem>>, %arg7: memref<1x128xf32, #tpu.memory_space<vmem>>, %arg8: memref<16x128xbf16, #tpu.memory_space<vmem>>) attributes {dimension_semantics = [#tpu.dimension_semantics<parallel>], iteration_bounds = array<i64: 2>, scalar_prefetch = 0 : i64, scratch_operands = 0 : i64, tpu.core_type = #tpu.core_type<tc>, window_params = [{transform_indices = @transform_0, window_bounds = array<i64: 16, 32>}, {pipeline_mode = #tpu.pipeline_mode<synchronous>, transform_indices = @transform_1, window_bounds = array<i64: 32, 32>}, {pipeline_mode = #tpu.pipeline_mode<synchronous>, transform_indices = @transform_2, window_bounds = array<i64: 1, 32>}, {pipeline_mode = #tpu.pipeline_mode<synchronous>, transform_indices = @transform_3, window_bounds = array<i64: 2, 32, 32>}, {pipeline_mode = #tpu.pipeline_mode<synchronous>, transform_indices = @transform_4, window_bounds = array<i64: 2, 32>}, {pipeline_mode = #tpu.pipeline_mode<synchronous>, transform_indices = @transform_5, window_bounds = array<i64: 32, 128>}, {pipeline_mode = #tpu.pipeline_mode<synchronous>, transform_indices = @transform_6, window_bounds = array<i64: 1, 128>}, {transform_indices = @transform_7, window_bounds = array<i64: 16, 128>}]} {
    %c0 = arith.constant 0 : index
    %c0_0 = arith.constant 0 : index
    %0 = vector.load %arg1[%c0, %c0_0] : memref<16x32xbf16, #tpu.memory_space<vmem>>, vector<16x32xbf16>
    %c0_1 = arith.constant 0 : index
    %c0_2 = arith.constant 0 : index
    %1 = vector.load %arg3[%c0_1, %c0_2] : memref<1x32xf32, #tpu.memory_space<vmem>>, vector<1x32xf32>
    %c0_3 = arith.constant 0 : index
    %c0_4 = arith.constant 0 : index
    %2 = vector.load %arg5[%c0_3, %c0_4] : memref<2x32xf32, #tpu.memory_space<vmem>>, vector<2x32xf32>
    %c0_5 = arith.constant 0 : index
    %c0_6 = arith.constant 0 : index
    %3 = vector.load %arg7[%c0_5, %c0_6] : memref<1x128xf32, #tpu.memory_space<vmem>>, vector<1x128xf32>
    %c0_7 = arith.constant 0 : index
    %c0_8 = arith.constant 0 : index
    %4 = vector.load %arg2[%c0_7, %c0_8] : memref<32x32xbf16, #tpu.memory_space<vmem>>, vector<32x32xbf16>
    %cst = arith.constant dense<0.000000e+00> : vector<16x32xf32>
    %5 = tpu.matmul %0, %4, %cst {dimension_numbers = #tpu.dot_dimension_numbers<[1], [0], [0], [1], [0, 0, 1, 1], [], []>} : vector<16x32xbf16>, vector<32x32xbf16>, vector<16x32xf32> -> vector<16x32xf32>
    %6 = vector.broadcast %1 : vector<1x32xf32> to vector<16x32xf32>
    %7 = arith.addf %5, %6 : vector<16x32xf32>
    %cst_9 = arith.constant 0.000000e+00 : f32
    %8 = vector.broadcast %cst_9 : f32 to vector<16x32xf32>
    %9 = arith.maximumf %7, %8 : vector<16x32xf32>
    %10 = arith.truncf %9 : vector<16x32xf32> to vector<16x32xbf16>
    %c0_10 = arith.constant 0 : index
    %c0_11 = arith.constant 0 : index
    %c0_12 = arith.constant 0 : index
    %11 = vector.load %arg4[%c0_10, %c0_11, %c0_12] : memref<2x32x32xbf16, #tpu.memory_space<vmem>>, vector<1x32x32xbf16>
    %12 = vector.shape_cast %11 : vector<1x32x32xbf16> to vector<32x32xbf16>
    %cst_13 = arith.constant dense<0.000000e+00> : vector<16x32xf32>
    %13 = tpu.matmul %10, %12, %cst_13 {dimension_numbers = #tpu.dot_dimension_numbers<[1], [0], [0], [1], [0, 0, 1, 1], [], []>} : vector<16x32xbf16>, vector<32x32xbf16>, vector<16x32xf32> -> vector<16x32xf32>
    %14 = vector.extract_strided_slice %2 {offsets = [0, 0], sizes = [1, 32], strides = [1, 1]} : vector<2x32xf32> to vector<1x32xf32>
    %15 = vector.broadcast %14 : vector<1x32xf32> to vector<16x32xf32>
    %16 = arith.addf %13, %15 : vector<16x32xf32>
    %cst_14 = arith.constant 0.000000e+00 : f32
    %17 = vector.broadcast %cst_14 : f32 to vector<16x32xf32>
    %18 = arith.maximumf %16, %17 : vector<16x32xf32>
    %19 = arith.truncf %18 : vector<16x32xf32> to vector<16x32xbf16>
    %c1 = arith.constant 1 : index
    %c0_15 = arith.constant 0 : index
    %c0_16 = arith.constant 0 : index
    %20 = vector.load %arg4[%c1, %c0_15, %c0_16] : memref<2x32x32xbf16, #tpu.memory_space<vmem>>, vector<1x32x32xbf16>
    %21 = vector.shape_cast %20 : vector<1x32x32xbf16> to vector<32x32xbf16>
    %cst_17 = arith.constant dense<0.000000e+00> : vector<16x32xf32>
    %22 = tpu.matmul %19, %21, %cst_17 {dimension_numbers = #tpu.dot_dimension_numbers<[1], [0], [0], [1], [0, 0, 1, 1], [], []>} : vector<16x32xbf16>, vector<32x32xbf16>, vector<16x32xf32> -> vector<16x32xf32>
    %23 = vector.extract_strided_slice %2 {offsets = [1, 0], sizes = [1, 32], strides = [1, 1]} : vector<2x32xf32> to vector<1x32xf32>
    %24 = vector.broadcast %23 : vector<1x32xf32> to vector<16x32xf32>
    %25 = arith.addf %22, %24 : vector<16x32xf32>
    %cst_18 = arith.constant 0.000000e+00 : f32
    %26 = vector.broadcast %cst_18 : f32 to vector<16x32xf32>
    %27 = arith.maximumf %25, %26 : vector<16x32xf32>
    %28 = arith.truncf %27 : vector<16x32xf32> to vector<16x32xbf16>
    %c0_19 = arith.constant 0 : index
    %c0_20 = arith.constant 0 : index
    %29 = vector.load %arg6[%c0_19, %c0_20] : memref<32x128xbf16, #tpu.memory_space<vmem>>, vector<32x128xbf16>
    %cst_21 = arith.constant dense<0.000000e+00> : vector<16x128xf32>
    %30 = tpu.matmul %28, %29, %cst_21 {dimension_numbers = #tpu.dot_dimension_numbers<[1], [0], [0], [1], [0, 0, 1, 1], [], []>} : vector<16x32xbf16>, vector<32x128xbf16>, vector<16x128xf32> -> vector<16x128xf32>
    %31 = vector.broadcast %3 : vector<1x128xf32> to vector<16x128xf32>
    %32 = arith.addf %30, %31 : vector<16x128xf32>
    %33 = math.tanh %32 : vector<16x128xf32>
    %34 = arith.truncf %33 : vector<16x128xf32> to vector<16x128xbf16>
    %c0_22 = arith.constant 0 : index
    %c0_23 = arith.constant 0 : index
    %35 = vector.load %arg8[%c0_22, %c0_23] : memref<16x128xbf16, #tpu.memory_space<vmem>>, vector<16x128xbf16>
    tpu.vector_store %arg8[%c0_22, %c0_23], %34 {strides = array<i32>} : memref<16x128xbf16, #tpu.memory_space<vmem>>, vector<16x128xbf16>,
    return
  }
  func.func @transform_0(%arg0: i32) -> (i32, i32) {
    %c0_i32 = arith.constant 0 : i32
    %c0_i32_0 = arith.constant 0 : i32
    return %arg0, %c0_i32 : i32, i32
  }
  func.func @transform_1(%arg0: i32) -> (i32, i32) {
    %c0_i32 = arith.constant 0 : i32
    %c0_i32_0 = arith.constant 0 : i32
    %c0_i32_1 = arith.constant 0 : i32
    return %c0_i32, %c0_i32_0 : i32, i32
  }
  func.func @transform_2(%arg0: i32) -> (i32, i32) {
    %c0_i32 = arith.constant 0 : i32
    %c0_i32_0 = arith.constant 0 : i32
    %c0_i32_1 = arith.constant 0 : i32
    return %c0_i32, %c0_i32_0 : i32, i32
  }
  func.func @transform_3(%arg0: i32) -> (i32, i32, i32) {
    %c0_i32 = arith.constant 0 : i32
    %c0_i32_0 = arith.constant 0 : i32
    %c0_i32_1 = arith.constant 0 : i32
    %c0_i32_2 = arith.constant 0 : i32
    return %c0_i32, %c0_i32_0, %c0_i32_1 : i32, i32, i32
  }
  func.func @transform_4(%arg0: i32) -> (i32, i32) {
    %c0_i32 = arith.constant 0 : i32
    %c0_i32_0 = arith.constant 0 : i32
    %c0_i32_1 = arith.constant 0 : i32
    return %c0_i32, %c0_i32_0 : i32, i32
  }
  func.func @transform_5(%arg0: i32) -> (i32, i32) {
    %c0_i32 = arith.constant 0 : i32
    %c0_i32_0 = arith.constant 0 : i32
    %c0_i32_1 = arith.constant 0 : i32
    return %c0_i32, %c0_i32_0 : i32, i32
  }
  func.func @transform_6(%arg0: i32) -> (i32, i32) {
    %c0_i32 = arith.constant 0 : i32
    %c0_i32_0 = arith.constant 0 : i32
    %c0_i32_1 = arith.constant 0 : i32
    return %c0_i32, %c0_i32_0 : i32, i32
  }
  func.func @transform_7(%arg0: i32) -> (i32, i32) {
    %c0_i32 = arith.constant 0 : i32
    %c0_i32_0 = arith.constant 0 : i32
    return %arg0, %c0_i32 : i32, i32
  }
}

</mosaic_0001>

<bundles_post_ra>
// kernel: tpu_custom_call.1
= control target key start
LH: loop header
LB: loop body
LE: loop exit
PB: predicated region body
PF: predicated region fallthrough
CT: control target
= control target key end

     0   :  { %12 = vsyncpa [#allocation3], 0  ;;  %s1471_s0 = inlined_call_operand.hbm [shape: bf16[32,32], index: 0, kind: input, shape index: {}]   ;;  %s1472_s1 = inlined_call_operand.hbm [shape: bf16[32,32], index: 1, kind: input, shape index: {}]   ;;  %s1473_s2 = inlined_call_operand.hbm [shape: f32[1,32], index: 2, kind: input, shape index: {}]   ;;  %s1474_s3 = inlined_call_operand.hbm [shape: bf16[2,32,32], index: 3, kind: input, shape index: {}]   ;;  %s1475_s4 = inlined_call_operand.vmem [shape: f32[2,32], index: 4, kind: input, shape index: {}]   ;;  %s1476_s5 = inlined_call_operand.vmem [shape: bf16[32,128], index: 5, kind: input, shape index: {}]   ;;  %s1477_s6 = inlined_call_operand.vmem [shape: f32[1,128], index: 6, kind: input, shape index: {}]   ;;  %s1478_s7 = inlined_call_operand.hbm [shape: bf16[32,128], index: 7, kind: output, shape index: {}]  }
   0x1   :  { %14 = vsyncpa [#allocation3 + $0x1], 0 }
   0x2   :  { %15 = vsyncpa [#allocation6], 0 }
   0x3   :  { %16 = vsyncpa [#allocation9], 0 }
   0x4   :  { %17 = vsyncpa [#allocation4], 0 }
   0x5   :  { %19 = vsyncpa [#allocation4 + $0x1], 0  ;;  %s1178_s24 = smov 0   ;;  %s1180_s25 = smov 0  }
   0x6   :  { %s1182_s26 = smov 0   ;;  %s1184_s27 = smov 0  }
   0x7 LB: > { %s1199_s28 = sadd.s32 4294967295, %s1125_s27   ;;  %s751_s29 = sadd.s32 4294967294, %s1125_s27   ;;  %s1125_s27 = sphi %s1184_s27, %s1504_s27   ;;  %s1121_s26 = sphi %s1182_s26, %s1503_s26   ;;  %s1117_s25 = sphi %s1180_s25, %s1502_s25   ;;  %s1113_s24 = sphi %s1178_s24, %s1501_s24  }
   0x8   : > { %p45_p0 = scmp.ne.s32.totalorder %s1117_s25, %s1113_s24  ;;  %p1479_p1 = scmp.eq.s32.totalorder %s1199_s28, 0 }
   0x9   : > { %p201_p3 = scmp.eq.s32.totalorder %s751_s29, 1  ;;  %p752_p5 = scmp.ge.s32.totalorder %s1125_s27, 1 }
   0xa   : > { %p1208_p4 = por %p1479_p1, %p45_p0  ;;  %p208_p7 = scmp.lt.s32.totalorder %s1125_s27, 3 }
   0xb   : > { %p1213_p6 = por %p201_p3, %p45_p0  ;;  %s1127_s10 = smov [#allocation5]  }
   0xc   : > { %s1483_s30 = scalar_select %p1208_p4, 1, 0 }
   0xd   : > { %s1484_s8 = scalar_select %p1213_p6, 1, 0 }
   0xe   : > { %p1218_p8 = pnand %p752_p5, %p208_p7  ;;  %s220_s11 = sshll.u32 %s1127_s10, 4  ;;  %s1222_s11 = int_to_ptr.vmem [resolvable:$true] %s220_s11 }
   0xf   : > { %1485 = sst [smem:[#allocation15_spill]] %s1484_s8  ;;  %s1128_s13 = smov [#allocation7]  }
  0x10   : > { %s1486_s9 = scalar_select %p1218_p8, 1, 0 }
  0x11   : > { %p857_p9 = pneg %p1218_p8  ;;  %s234_s14 = sshll.u32 %s1128_s13, 4  ;;  %s1233_s14 = int_to_ptr.vmem [resolvable:$true] %s234_s14 }
  0x12   : > { %s1129_s15 = smov [#allocation8]   ;;  %s937_s19 = scalar_lea.hbm %s1472_s1, 256 }
  0x13   : > { %p1229_p11 = pnand %p857_p9, %p1479_p1  ;;  %s1235_s16 = sshll.u32 %s1129_s15, 4  ;;  %s245_s16 = int_to_ptr.vmem [resolvable:$true] %s1235_s16 }
  0x14   : > { %p938_p12 = scmp.ne.s32.totalorder %s1472_s1, %s937_s19  ;;  %p944_p5 = scmp.lt.u32.totalorder %s937_s19, %s1472_s1 }
  0x15   : > { %p1245_p13 = pneg %p1229_p11 }
  0x17   : > { %p940_p0 = pnand %p1245_p13, %p938_p12 }
  0x19   : > { %p941_p3 = pneg %p940_p0 }
  0x1b   : > { %p946_p7 = pnand %p944_p5, %p941_p3 }
  0x1d   : > { %949 = shalt.err (!%p946_p7)
}
  0x1e   : > { %s950_s10 = scalar_lea.vmem %s1222_s11, 256  ;;  %p958_p2 = scmp.lt.s32.totalorder %s1222_s11, %s1222_s11 }
  0x1f   : > { %p951_p9 = scmp.ne.s32.totalorder %s1222_s11, %s950_s10  ;;  %p959_p6 = scmp.lt.s32.totalorder %s950_s10, %s950_s10 }
  0x21   : > { %p953_p10 = pnand %p951_p9, %p1245_p13  ;;  %p960_p12 = por %p959_p6, %p958_p2 }
  0x23   : > { %p954_p1 = pneg %p953_p10 }
  0x25   : > { %p961_p0 = pnand %p960_p12, %p954_p1 }
  0x27   : > { %964 = shalt.err (!%p961_p0)
}
  0x28   : > { %s1130_s13 = smov 64   ;;  %s1131_s15 = smov 4  }
  0x29   : > { %860 = dma.hbm_to_vmem [thread:$0]  (!%p1229_p11), %s1472_s1, 256, %s1222_s11, [#allocation6], %s1130_s13, %s1130_s13, %s1131_s15  }
  0x2a   : > { %s965_s21 = scalar_lea.hbm %s1473_s2, 16 }
  0x2b   : > { %p966_p1 = scmp.ne.s32.totalorder %s1473_s2, %s965_s21  ;;  %p972_p10 = scmp.lt.u32.totalorder %s965_s21, %s1473_s2 }
  0x2d   : > { %p968_p2 = pnand %p966_p1, %p1245_p13 }
  0x2f   : > { %p969_p6 = pneg %p968_p2 }
  0x31   : > { %p974_p3 = pnand %p972_p10, %p969_p6 }
  0x33   : > { %977 = shalt.err (!%p974_p3)
}
  0x34   : > { %s978_s11 = scalar_lea.vmem %s1233_s14, 16  ;;  %s985_s17 = scalar_lea.vmem %s1233_s14, 32 }
  0x35   : > { %p979_p5 = scmp.ne.s32.totalorder %s1233_s14, %s978_s11  ;;  %p986_p12 = scmp.lt.s32.totalorder %s1233_s14, %s1233_s14 }
  0x36   : > { %p987_p0 = scmp.lt.s32.totalorder %s985_s17, %s978_s11 }
  0x37   : > { %p981_p7 = pnand %p979_p5, %p1245_p13 }
  0x38   : > { %p988_p1 = por %p987_p0, %p986_p12 }
  0x39   : > { %p982_p9 = pneg %p981_p7 }
  0x3b   : > { %p989_p2 = pnand %p988_p1, %p982_p9 }
  0x3d   : > { %992 = shalt.err (!%p989_p2)
}
  0x3e   : > { %863 = dma.hbm_to_vmem [thread:$0]  (!%p1229_p11), %s1473_s2, 16, %s1233_s14, [#allocation6]  }
  0x3f   : > { %s993_s21 = scalar_lea.hbm %s1474_s3, 512 }
  0x40   : > { %p994_p6 = scmp.ne.s32.totalorder %s1474_s3, %s993_s21  ;;  %p1000_p5 = scmp.lt.u32.totalorder %s993_s21, %s1474_s3 }
  0x42   : > { %p996_p10 = pnand %p994_p6, %p1245_p13 }
  0x44   : > { %p997_p3 = pneg %p996_p10 }
  0x46   : > { %p1002_p7 = pnand %p1000_p5, %p997_p3 }
  0x48   : > { %1005 = shalt.err (!%p1002_p7)
}
  0x49   : > { %s1006_s17 = scalar_lea.vmem %s245_s16, 512  ;;  %p1014_p1 = scmp.lt.s32.totalorder %s245_s16, %s245_s16 }
  0x4a   : > { %p1007_p9 = scmp.ne.s32.totalorder %s245_s16, %s1006_s17  ;;  %p1015_p2 = scmp.lt.s32.totalorder %s1006_s17, %s1006_s17 }
  0x4c   : > { %p1009_p12 = pnand %p1007_p9, %p1245_p13  ;;  %p1016_p4 = por %p1015_p2, %p1014_p1 }
  0x4e   : > { %p1010_p0 = pneg %p1009_p12 }
  0x50   : > { %p1017_p8 = pnand %p1016_p4, %p1010_p0 }
  0x52   : > { %1020 = shalt.err (!%p1017_p8)
}
  0x53   : > { %866 = dma.hbm_to_vmem [thread:$0]  (!%p1229_p11), %s1474_s3, 512, %s245_s16, [#allocation9], %s1130_s13, %s1130_s13, %s1131_s15  }
  0x54   : > { %s1316_s22 = sadd.s32 1, %s1125_s27   ;;  %s32_s18 = sadd.s32 1, %s1121_s26 }
  0x55   : > { %s29_s12 = ssub.s32 %s1125_s27, %s1316_s22  ;;  %p39_p8 = scmp.ne.s32.totalorder %s1121_s26, %s1117_s25 }
  0x56   : > { %p30_p4 = scmp.eq.s32.totalorder %s29_s12, 0  ;;  %p40_p13 = scmp.eq.s32.totalorder %s1125_s27, 0 }
  0x57   : > { %p878_p6 = scmp.lt.s32.totalorder %s1125_s27, 2  ;;  %p1489_p3 = scmp.eq.s32.totalorder %s1199_s28, 1 }
  0x58   : > { %s1326_s19 = scalar_select %p30_p4, %s1121_s26, %s32_s18  }
  0x59   : > { %p41_p10 = por %p40_p13, %p39_p8  ;;  %p1330_p5 = por %p1489_p3, %p39_p8 }
  0x5a   : > { %s267_s21 = sand.u32 1, %s1121_s26   ;;  %s788_s23 = sshll.u32 %s1125_s27, 7 }
  0x5b   : > { %s757_s16 = sshll.u32 %s267_s21, 3  ;;  %s1339_s11 = scalar_lea.hbm %s1471_s0, %s788_s23 }
  0x5c   : > { %s271_s17 = scalar_lea.vmem [#allocation2], %s757_s16  ;;  %p1341_p11 = pnand %p878_p6, %p41_p10 }
  0x5d   : > { %s278_s14 = sshll.u32 %s271_s17, 4  ;;  %s1347_s12 = scalar_lea.sflag [#allocation3], %s267_s21  ;;  %s1345_s14 = int_to_ptr.vmem [resolvable:$true] %s278_s14 }
  0x5e   : > { %s1021_s18 = scalar_lea.hbm %s1339_s11, 128  ;;  %p1023_p9 = pneg %p1341_p11 }
  0x5f   : > { %p1022_p7 = scmp.ne.s32.totalorder %s1339_s11, %s1021_s18  ;;  %s1026_s29 = scalar_lea.hbm %s1471_s0, 256 }
  0x60   : > { %p1027_p1 = scmp.lt.u32.totalorder %s1339_s11, %s1471_s0  ;;  %p1028_p2 = scmp.lt.u32.totalorder %s1026_s29, %s1021_s18 }
  0x61   : > { %p1024_p12 = pnand %p1023_p9, %p1022_p7  ;;  %p1030_p8 = scmp.lt.u32.totalorder %s1021_s18, %s1339_s11 }
  0x62   : > { %p1029_p4 = por %p1028_p2, %p1027_p1 }
  0x63   : > { %p1025_p0 = pneg %p1024_p12 }
  0x64   : > { %p1031_p13 = por %p1030_p8, %p1029_p4 }
  0x66   : > { %p1032_p6 = pnand %p1031_p13, %p1025_p0 }
  0x68   : > { %1035 = shalt.err (!%p1032_p6)
}
  0x69   : > { %s1036_s21 = scalar_lea.vmem %s1345_s14, 128  ;;  %s1132_s23 = smov [#allocation2]  }
  0x6a   : > { %p1037_p10 = scmp.ne.s32.totalorder %s1345_s14, %s1036_s21  ;;  %s1041_s16 = sshll.u32 %s1132_s23, 4  ;;  %s1042_s16 = int_to_ptr.vmem [resolvable:$false] %s1041_s16 }
  0x6b   : > { %s1043_s10 = scalar_lea.vmem %s1042_s16, 256  ;;  %p1044_p12 = scmp.lt.s32.totalorder %s1345_s14, %s1042_s16 }
  0x6c   : > { %p1039_p3 = pnand %p1037_p10, %p1023_p9  ;;  %p1045_p1 = scmp.lt.s32.totalorder %s1043_s10, %s1036_s21 }
  0x6e   : > { %p1040_p7 = pneg %p1039_p3  ;;  %p1046_p2 = por %p1045_p1, %p1044_p12 }
  0x70   : > { %p1047_p4 = pnand %p1046_p2, %p1040_p7 }
  0x72   : > { %1050 = shalt.err (!%p1047_p4)
}
  0x73   : > { %870 = dma.hbm_to_vmem [thread:$0]  (!%p1341_p11), %s1339_s11, 128, %s1345_s14, %s1347_s12, %s1130_s13, %s1130_s13, %s1131_s15  }
  0x74   : > { %p1492_p9 = scmp.ne.s32.totalorder %s1486_s9, 0 }
  0x75   : > { %s1381_s18 = sand.u32 (!%p1492_p9), 1, %s1117_s25   ;;  %p1493_p0 = scmp.ne.s32.totalorder (!%p1492_p9), %s1483_s30, 0 }
  0x76   : > { %290 = sbr.rel (%p1492_p9) target bundleno = 1047 (0x417), region = 48  ;;  %s761_s29 = sshll.u32 (!%p1492_p9), %s1381_s18, 3 }
  0x77   : > { %s293_s17 = scalar_lea.sflag (!%p1492_p9), [#allocation3], %s1381_s18  ;;  %s296_s8 = scalar_lea.vmem (!%p1492_p9), [#allocation2], %s761_s29 }
  0x7d   : > { %1096 = dma.done.wait (%p1493_p0), %s293_s17, 128  }
  0x7e   : > { %1098 = vsyncadd (%p1493_p0), %s293_s17, 4294967168  ;;  %p1494_p11 = scmp.eq.s32.totalorder %s1199_s28, 0 }
  0x80   : > { %1100 = dma.done.wait (%p1494_p11), [#allocation6], 272   ;;  %p1495_p8 = pmov %p1494_p11 }
  0x82   : > { %1102 = vsyncadd (%p1495_p8), [#allocation6], 4294967024  ;;  %p1496_p13 = pmov %p1495_p8 }
  0x83   : > { %p1497_p6 = pmov %p1495_p8 }
  0x84   : > { %1104 = dma.done.wait (%p1496_p13), [#allocation9], 512  }
  0x85   : > { %1106 = vsyncadd (%p1497_p6), [#allocation9], 4294966784  ;;  %v1133_v0 = vmov 0.0   ;;  %vm1134_vm0 = vmmov 0   ;;  %v924_v1 = vld [vmem:[#allocation5] sm:$0xff]   ;;  %v925_v2 = vld [vmem:[#allocation5 + $0x8] sm:$0xff]   ;;  %v426_v18 = vlaneseq }
  0x86   : > { %809 = vmatprep.subr.bf16.mxu0 %v1133_v0  ;;  %813 = vmatprep.mubr.msk.bf16.mxu0 %vm1134_vm0, %v1133_v0  ;;  %v926_v3 = vld [vmem:[%s296_s8] sm:$0xff]   ;;  %vm374_vm1 = vcmask 261120   ;;  %v929_v16 = vld [vmem:[#allocation8 + $0x10] sm:$0xff]   ;;  %s791_s23 = sshll.u32 %s1199_s28, 7  ;;  %s338_s16 = scalar_lea.vmem [#allocation10], %s761_s29 }
  0x87   : > { %817 = vmatprep.subr.bf16.mxu1 %v1133_v0  ;;  %821 = vmatprep.mubr.msk.bf16.mxu1 %vm1134_vm0, %v1133_v0  ;;  %v927_v4 = vld [vmem:[#allocation8] sm:$0xff]   ;;  %v928_v5 = vld [vmem:[#allocation8 + $0x8] sm:$0xff]   ;;  %v766_v6 = vld [vmem:[#allocation7] ss:$0 sm:$0xff]  ;;  %v427_v19 = vshrl.u32 %v426_v18, 7  ;;  %s649_s10 = sshll.u32 %s338_s16, 4  ;;  %s1425_s30 = scalar_lea.hbm %s1478_s7, %s791_s23  ;;  %s1427_s10 = int_to_ptr.vmem [resolvable:$true] %s649_s10 }
  0x88   : > { %810 = vmatpush3.bf16.msra.mxu0 %v924_v1  ;;  %818 = vmatpush3.bf16.msra.mxu1 %v927_v4  ;;  %v930_v17 = vld [vmem:[#allocation8 + $0x18] sm:$0xff]   ;;  %v932_v33 = vld [vmem:[%s1476_s5 + $0x8] sm:$0xff]   ;;  %s636_s9 = scalar_lea.sflag [#allocation4], %s1381_s18  ;;  %s1051_s13 = scalar_lea.vmem %s1427_s10, 128 }
  0x89   : > { %811 = vmatprep.subr.bf16.mxu0 %v1133_v0  ;;  %819 = vmatprep.subr.bf16.mxu1 %v1133_v0  ;;  %v428_v20 = vsub.s32 0, %v427_v19  ;;  %v345_v21 = vld [vmem:[%s1475_s4] sm:$0x3]  ;;  %v496_v34 = vsub.s32 1, %v427_v19  ;;  %p1052_p10 = scmp.ne.s32.totalorder %s1427_s10, %s1051_s13  ;;  %s1135_s28 = smov [#allocation10]  }
  0x8a   : > { %v931_v32 = vld [vmem:[%s1476_s5] sm:$0xff]   ;;  %s1055_s29 = sshll.u32 %s1135_s28, 4  ;;  %s1056_s29 = int_to_ptr.vmem [resolvable:$false] %s1055_s29 }
  0x8b   : > { %v429_v22 = vrot.slane %v345_v21, %v428_v20  ;;  %v497_v35 = vrot.slane %v345_v21, %v496_v34  ;;  %v777_v45 = vld [vmem:[%s1477_s6] ss:$0 sm:$0xff]  ;;  %p1053_p3 = pnand %p1052_p10, %p1330_p5  ;;  %s1057_s15 = scalar_lea.vmem %s1056_s29, 256 }
  0x8c   : > { %812 = vmatpush3.bf16.msra.mxu0 %v925_v2  ;;  %820 = vmatpush3.bf16.msra.mxu1 %v928_v5  ;;  %p1058_p12 = scmp.lt.s32.totalorder %s1427_s10, %s1056_s29  ;;  %p1059_p1 = scmp.lt.s32.totalorder %s1057_s15, %s1051_s13 }
  0x8d   : > { %825 = vmatprep.subr.bf16.mxu0 %v1133_v0  ;;  %833 = vmatprep.subr.bf16.mxu1 %v1133_v0  ;;  %p1054_p7 = pneg %p1053_p3 }
  0x8e   : > { %p1060_p2 = por %p1059_p1, %p1058_p12 }
  0x8f   : > { %814 = vmatmul.mubr.msk.bf16.vlgmr.msra.gmra.mrb[0].mxu0 %vm374_vm1, %v926_v3 }
  0x90   : > { %829 = vmatprep.mubr.msk.bf16.mxu0 %vm1134_vm0, %v1133_v0  ;;  %826 = vmatpush3.bf16.msra.mxu0 %v929_v16  ;;  %p1061_p4 = pnand %p1060_p2, %p1054_p7 }
  0x91   : > { %827 = vmatprep.subr.bf16.mxu0 %v1133_v0 }
  0x94   : > { %828 = vmatpush3.bf16.msra.mxu0 %v930_v17 }
 0x162   : > { %v412_v7 = vpop.f32.mrb[0].mxu0 }
 0x163   : > { %v413_v8 = vadd.f32 %v766_v6, %v412_v7  ;;  %v815_v9 = vpop.f32.mrb[1].mxu0 }
 0x164   : > { %v415_v10 = vpop.f32.mrb[2].mxu0 }
 0x165   : > { %v416_v11 = vadd.f32 %v766_v6, %v415_v10  ;;  %v816_v12 = vpop.f32.mrb[3].mxu0  ;;  %v419_v13 = vmax.f32 %v413_v8, 0.0 }
 0x167   : > { %v420_v14 = vmax.f32 %v416_v11, 0.0 }
 0x169   : > { %v421_v15 = vpack.c.bf16 %v420_v14, %v419_v13 }
 0x16b   : > { %822 = vmatmul.mubr.msk.bf16.vlgmr.msra.gmra.mrb[0].mxu1 %vm374_vm1, %v421_v15 }
 0x16c   : > { %837 = vmatprep.mubr.msk.bf16.mxu1 %vm1134_vm0, %v1133_v0  ;;  %834 = vmatpush3.bf16.msra.mxu1 %v931_v32 }
 0x16d   : > { %835 = vmatprep.subr.bf16.mxu1 %v1133_v0 }
 0x170   : > { %836 = vmatpush3.bf16.msra.mxu1 %v932_v33 }
 0x23e   : > { %v479_v23 = vpop.f32.mrb[0].mxu1 }
 0x23f   : > { %v480_v24 = vadd.f32 %v479_v23, %v429_v22  ;;  %v823_v25 = vpop.f32.mrb[1].mxu1 }
 0x240   : > { %v482_v26 = vpop.f32.mrb[2].mxu1 }
 0x241   : > { %v483_v27 = vadd.f32 %v482_v26, %v429_v22  ;;  %v824_v28 = vpop.f32.mrb[3].mxu1  ;;  %v486_v29 = vmax.f32 %v480_v24, 0.0 }
 0x243   : > { %v487_v30 = vmax.f32 %v483_v27, 0.0 }
 0x245   : > { %v488_v31 = vpack.c.bf16 %v487_v30, %v486_v29 }
 0x247   : > { %830 = vmatmul.mubr.msk.bf16.vlgmr.msra.gmra.mrb[4].mxu0 %vm374_vm1, %v488_v31 }
 0x31a   : > { %v547_v36 = vpop.f32.mrb[4].mxu0 }
 0x31b   : > { %v548_v37 = vadd.f32 %v547_v36, %v497_v35  ;;  %v831_v38 = vpop.f32.mrb[5].mxu0 }
 0x31c   : > { %v550_v39 = vpop.f32.mrb[6].mxu0 }
 0x31d   : > { %v551_v40 = vadd.f32 %v550_v39, %v497_v35  ;;  %v832_v41 = vpop.f32.mrb[7].mxu0  ;;  %v554_v42 = vmax.f32 %v548_v37, 0.0 }
 0x31f   : > { %v555_v43 = vmax.f32 %v551_v40, 0.0 }
 0x321   : > { %v556_v44 = vpack.c.bf16 %v555_v43, %v554_v42 }
 0x323   : > { %838 = vmatmul.mubr.msk.bf16.vlgmr.msra.gmra.mrb[4].mxu1 %vm374_vm1, %v556_v44 }
 0x3f6   : > { %v616_v46 = vpop.f32.mrb[4].mxu1 }
 0x3f7   : > { %v617_v47 = vadd.f32 %v777_v45, %v616_v46  ;;  %v839_v48 = vpop.f32.mrb[5].mxu1 }
 0x3f8   : > { %v619_v49 = vpop.f32.mrb[6].mxu1 }
 0x3f9   : > { %v620_v50 = vadd.f32 %v777_v45, %v619_v49  ;;  %v840_v51 = vpop.f32.mrb[7].mxu1  ;;  %933 = vtanh.f32 %v617_v47 }
 0x3fb   : > { %935 = vtanh.f32 %v620_v50 }
 0x403   : > { %v934_v52 = vpop.eup %933 }
 0x405   : > { %v936_v53 = vpop.eup %935 }
 0x406   : > { %v795_v54 = vpack.c.bf16 %v936_v53, %v934_v52 }
 0x408   : > { %796 = vst [vmem:[%s338_s16] sm:$0xff] %v795_v54  }
 0x409   : > { %1064 = shalt.err (!%p1061_p4)
}
 0x40a   : > { %s1065_s11 = scalar_lea.hbm %s1425_s30, 128  ;;  %s1069_s21 = scalar_lea.hbm %s1478_s7, 256 }
 0x40b   : > { %p1066_p9 = scmp.ne.s32.totalorder %s1425_s30, %s1065_s11  ;;  %p1070_p8 = scmp.lt.u32.totalorder %s1425_s30, %s1478_s7 }
 0x40c   : > { %p1071_p13 = scmp.lt.u32.totalorder %s1069_s21, %s1065_s11  ;;  %p1073_p10 = scmp.lt.u32.totalorder %s1065_s11, %s1425_s30 }
 0x40d   : > { %p1067_p0 = pnand %p1066_p9, %p1330_p5 }
 0x40e   : > { %p1072_p6 = por %p1071_p13, %p1070_p8 }
 0x40f   : > { %p1068_p11 = pneg %p1067_p0 }
 0x410   : > { %p1074_p3 = por %p1073_p10, %p1072_p6 }
 0x412   : > { %p1075_p7 = pnand %p1074_p3, %p1068_p11 }
 0x414   : > { %1078 = shalt.err (!%p1075_p7)
}
 0x415   : > { %s1136_s17 = smov 64   ;;  %s1137_s8 = smov 4  }
 0x416   : > { %855 = dma.vmem_to_hbm [thread:$0]  (%p1330_p5), %s1427_s10, 128, %s1425_s30, %s636_s9, %s1136_s17, %s1136_s17, %s1137_s8  }
 0x417 PF: > { %s1498_s13 = sld [smem:[#allocation15_spill]]  ;;  %s664_s28 = sand.u32 1, %s1113_s24  }
 0x418   : > { %p1500_p1 = scmp.ge.s32.totalorder %s1125_s27, 2  ;;  %s665_s29 = scalar_lea.sflag [#allocation4], %s664_s28 }
 0x41d   : > { %p1499_p12 = scmp.ne.s32.totalorder %s1498_s13, 0 }
 0x41f   : > { %p872_p2 = pnand %p1500_p1, %p1499_p12 }
 0x421   : > { %1108 = dma.done.wait (!%p872_p2), %s665_s29, 128  }
 0x422   : > { %1110 = vsyncadd (!%p872_p2), %s665_s29, 4294967168  ;;  %p22_p4 = scmp.ge.s32.totalorder %s1316_s22, 4   ;;  %s1501_s24 = smov %s1117_s25 }
 0x423   : > { %s1502_s25 = smov %s1121_s26  ;;  %s1503_s26 = smov %s1326_s19 }
 0x424   : > { %s1504_s27 = smov %s1316_s22  ;;  %24 = sbr.rel (!%p22_p4) target bundleno = 7 (0x7), region = 106 }
 0x42b   :  { %670 = vsyncpa [#allocation3], 1 }
 0x42c   :  { %672 = vsyncpa [#allocation3 + $0x1], 1 }
 0x42d   :  { %673 = vsyncpa [#allocation6], 1 }
 0x42e   :  { %674 = vsyncpa [#allocation9], 1 }
 0x42f   :  { %675 = vsyncpa [#allocation4], 1 }
 0x430   :  { %677 = vsyncpa [#allocation4 + $0x1], 1 }

</bundles_post_ra>
